<compile_context>
chip_gen: v7x
topology: tpu7x:2x2x1
jax: 0.10.0
libtpu: 0.0.40
codegen_flags: <defaults>
</compile_context>

<pallas_src>
import functools
import numpy as np
import jax
import jax.numpy as jnp
from jax.experimental import pallas as pl
from jax.experimental.pallas import tpu as pltpu


def _act(name):
    if name == "relu":
        return lambda v: jnp.maximum(v, 0.0)
    if name == "tanh":
        return jnp.tanh
    if name == "sigmoid":
        return jax.nn.sigmoid
    if name == "elu":
        return lambda v: jnp.where(v > 0, v, jnp.expm1(v))
    raise ValueError(name)


def _round_up(n, m):
    return ((n + m - 1) // m) * m


def _encoder_kernel(x_ref, w1_ref, b1_ref, w2_ref, b2_ref, wf_ref, bf_ref,
                    out_ref, *, nonlinearity):
    """One batch tile: three MXU matmuls (1x1 conv already folded into w1)."""
    act = _act(nonlinearity)

    # hidden1 (conv fused into the weight): (Bt, L*A) @ (L*A, H1) -> f32
    h1 = act(jnp.dot(x_ref[...], w1_ref[...],
                     preferred_element_type=jnp.float32) + b1_ref[...])

    # hidden2: (Bt, H1) @ (H1, H2)
    h2 = act(jnp.dot(h1, w2_ref[...],
                     preferred_element_type=jnp.float32) + b2_ref[...])

    # fused heads: (Bt, H2) @ (H2, 2Z) -> [z_loc | z_logsig]
    out_ref[...] = (jnp.dot(h2, wf_ref[...],
                            preferred_element_type=jnp.float32)
                    + bf_ref[...]).astype(out_ref.dtype)


def init_encoder_params(key, hidden_architecture, z_dim, convolve,
                        conv_encoder_size, alph_size, seq_len):
    """Deterministic init mirroring the PyTorch __init__ (xavier_normal_, const biases)."""
    def xavier_normal(k, out_in):
        fan_out, fan_in = out_in
        std = np.sqrt(2.0 / (fan_in + fan_out))
        return (std * jax.random.normal(k, out_in)).astype(jnp.float32)

    ks = jax.random.split(key, 5)
    h1, h2 = hidden_architecture
    channel_size = conv_encoder_size if convolve else alph_size
    params = dict(
        w1=xavier_normal(ks[1], (h1, channel_size * seq_len)),
        b1=jnp.full((h1,), 0.1, jnp.float32),
        w2=xavier_normal(ks[2], (h2, h1)),
        b2=jnp.full((h2,), 0.1, jnp.float32),
        wf1=xavier_normal(ks[3], (z_dim, h2)),
        bf1=jnp.full((z_dim,), 0.1, jnp.float32),
        wf2=xavier_normal(ks[4], (z_dim, h2)),
        bf2=jnp.full((z_dim,), -5.0, jnp.float32),
    )
    if convolve:
        # Conv1d(alph_size, C, kernel_size=1, bias=False) weight, (C, A, 1) squeezed.
        params["conv_w"] = xavier_normal(ks[0], (conv_encoder_size, alph_size))
    return params


def encoder_forward(params, x, *, convolve=True, nonlinearity="relu",
                    batch_tile=4096):
    """x: (B, seq_len, alph_size). Returns (z_loc, z_logsig), each (B, z_dim) float32.

    x is streamed in its incoming dtype (no wrapper-side cast: a standalone
    astype would add a full extra HBM pass).  Callers wanting bf16/fp8
    streaming should provide x already in that dtype.
    """
    B, L, A = x.shape
    H1 = params["w1"].shape[0]
    H2 = params["w2"].shape[0]
    Z = params["wf1"].shape[0]
    lA = L * A

    # ---- weight plumbing (done once, outside the kernel) ----
    if convolve:
        C = params["conv_w"].shape[0]
        # PyTorch: conv_out[b,c,l] = sum_a conv_w[c,a] * x[b,l,a]; flattened as
        # f[b, c*L + l]; h1 = f @ W1.T.  Folding the conv:
        #   Wfused[l*A + a, h] = sum_c conv_w[c, a] * W1[h, c*L + l]
        w1r = params["w1"].reshape(H1, C, L)
        w_fused = jnp.einsum("ca,hcl->lah", params["conv_w"], w1r).reshape(lA, H1)
    else:
        # Non-convolve branch: PyTorch flattens x row-major (index l*A + a).
        # TODO(synk): this assumes the standard contiguous row-major .view() flatten order.
        w_fused = params["w1"].T

    stream_dtype = x.dtype
    w_fused = w_fused.astype(stream_dtype)      # dominant streamed weight matches x
    w2t = params["w2"].T.astype(jnp.float32)                       # (H1, H2)
    wf = jnp.concatenate([params["wf1"].T, params["wf2"].T], 1)    # (H2, 2Z)
    wf = wf.astype(jnp.float32)
    bf = jnp.concatenate([params["bf1"], params["bf2"]]).reshape(1, 2 * Z)
    bf = bf.astype(jnp.float32)
    b1 = params["b1"].reshape(1, H1).astype(jnp.float32)
    b2 = params["b2"].reshape(1, H2).astype(jnp.float32)

    # ---- input: free contiguous reshape only (no pad, no cast) ----
    x_flat = x.reshape(B, lA)

    # Sublane alignment of the batch tile matches the packed-dtype native tile.
    x_item = jnp.dtype(stream_dtype).itemsize
    align = {4: 8, 2: 16, 1: 32}.get(x_item, 8)
    bt = _round_up(min(batch_tile, _round_up(B, align)), align)
    grid = pl.cdiv(B, bt)

    # ---- VMEM budget / cost estimate ----
    weight_bytes = (w_fused.size * x_item + w2t.size * 4 + wf.size * 4
                    + b1.size * 4 + b2.size * 4 + bf.size * 4)
    per_step_vmem = (2 * bt * lA * x_item          # double-buffered x tile
                     + 2 * bt * 2 * Z * 4          # double-buffered out tile
                     + bt * (H1 + H2) * 4          # h1/h2 temporaries
                     + 2 * weight_bytes)
    vmem_limit = None
    if per_step_vmem * 2 > (14 << 20):             # would risk v5e's 16 MiB default
        vmem_limit = min(per_step_vmem * 2 + (2 << 20), 48 << 20)

    cost = pl.CostEstimate(
        flops=2 * B * (lA * H1 + H1 * H2 + H2 * 2 * Z),
        transcendentals=0,
        bytes_accessed=B * lA * x_item + B * 2 * Z * 4 + weight_bytes,
    )

    cp_kwargs = dict(dimension_semantics=("parallel",))
    if vmem_limit is not None:
        cp_kwargs["vmem_limit_bytes"] = int(vmem_limit)

    kernel = functools.partial(_encoder_kernel, nonlinearity=nonlinearity)

    def const_spec(shape):
        return pl.BlockSpec(shape, lambda i: (0, 0))

    out = pl.pallas_call(
        kernel,
        out_shape=jax.ShapeDtypeStruct((B, 2 * Z), jnp.float32),
        grid=(grid,),
        in_specs=[
            pl.BlockSpec((bt, lA), lambda i: (i, 0)),      # x tile (streamed)
            const_spec((lA, H1)),                          # fused hidden1 weight
            const_spec((1, H1)),                           # b1
            const_spec((H1, H2)),                          # w2
            const_spec((1, H2)),                           # b2
            const_spec((H2, 2 * Z)),                       # [wf1 | wf2]
            const_spec((1, 2 * Z)),                        # [bf1 | bf2]
        ],
        out_specs=pl.BlockSpec((bt, 2 * Z), lambda i: (i, 0)),
        compiler_params=pltpu.CompilerParams(**cp_kwargs),
        cost_estimate=cost,
    )(x_flat, w_fused, b1, w2t, b2, wf, bf)

    z_loc = out[:, :Z]
    z_logsig = out[:, Z:]
    return z_loc, z_logsig


def encoder_reference(params, x, *, convolve=True, nonlinearity="relu"):
    """Pure-numpy reproduction of the PyTorch forward."""
    xn = np.asarray(x, np.float32)
    B, L, A = xn.shape
    if convolve:
        C = params["conv_w"].shape[0]
        xp = np.transpose(xn, (0, 2, 1))                               # (B, A, L)
        conv = np.einsum("ca,bal->bcl", np.asarray(params["conv_w"]), xp)
        f = conv.reshape(B, C * L)                                     # channel-major flatten
    else:
        f = xn.reshape(B, L * A)

    def act(v):
        if nonlinearity == "relu":
            return np.maximum(v, 0.0)
        raise ValueError(nonlinearity)

    h1 = act(f @ np.asarray(params["w1"]).T + np.asarray(params["b1"]))
    h2 = act(h1 @ np.asarray(params["w2"]).T + np.asarray(params["b2"]))
    z_loc = h2 @ np.asarray(params["wf1"]).T + np.asarray(params["bf1"])
    z_logsig = h2 @ np.asarray(params["wf2"]).T + np.asarray(params["bf2"])
    return z_loc, z_logsig


if __name__ == "__main__":
    # Small shapes consistent with the module.
    seq_len, alph_size = 8, 16
    conv_encoder_size = 8
    hidden_architecture = [32, 32]
    z_dim = 8

    key = jax.random.PRNGKey(0)
    kx, kp, kx2 = jax.random.split(key, 3)

    # --- convolve_encoder=True branch, small batch, f32 streaming ---
    B = 4
    x = jax.random.normal(kx, (B, seq_len, alph_size), dtype=jnp.float32)
    params = init_encoder_params(kp, hidden_architecture, z_dim, True,
                                 conv_encoder_size, alph_size, seq_len)
    ref_loc, ref_logsig = encoder_reference(params, x, convolve=True)
    z_loc, z_logsig = encoder_forward(params, x, convolve=True)
    jax.block_until_ready((z_loc, z_logsig))
    assert np.allclose(np.asarray(z_loc), ref_loc, rtol=1e-4, atol=1e-4)
    assert np.allclose(np.asarray(z_logsig), ref_logsig, rtol=1e-4, atol=1e-4)

    # --- multi-step ragged grid (exercises pl.cdiv tiling, no wrapper pad) ---
    B2 = 300
    x2 = jax.random.normal(kx2, (B2, seq_len, alph_size), dtype=jnp.float32)
    ref_loc2, ref_logsig2 = encoder_reference(params, x2, convolve=True)
    z_loc2, z_logsig2 = encoder_forward(params, x2, convolve=True, batch_tile=128)
    jax.block_until_ready((z_loc2, z_logsig2))
    assert np.allclose(np.asarray(z_loc2), ref_loc2, rtol=1e-4, atol=1e-4)
    assert np.allclose(np.asarray(z_logsig2), ref_logsig2, rtol=1e-4, atol=1e-4)

    # --- bf16 streaming path: x arrives in bf16 (no wrapper-side cast added) ---
    x_bf16 = x2.astype(jnp.bfloat16)
    z_loc16, z_logsig16 = encoder_forward(params, x_bf16, convolve=True, batch_tile=128)
    jax.block_until_ready((z_loc16, z_logsig16))
    ref_loc16, ref_logsig16 = encoder_reference(params, np.asarray(x_bf16, np.float32),
                                                convolve=True)
    assert np.allclose(np.asarray(z_loc16), ref_loc16, rtol=5e-2, atol=5e-2)
    assert np.allclose(np.asarray(z_logsig16), ref_logsig16, rtol=5e-2, atol=5e-2)

    # --- convolve_encoder=False branch (hidden1 on plain flatten of x) ---
    params_nc = init_encoder_params(kp, hidden_architecture, z_dim, False,
                                    conv_encoder_size, alph_size, seq_len)
    ref_loc_nc, ref_logsig_nc = encoder_reference(params_nc, x, convolve=False)
    z_loc_nc, z_logsig_nc = encoder_forward(params_nc, x, convolve=False)
    jax.block_until_ready((z_loc_nc, z_logsig_nc))
    assert np.allclose(np.asarray(z_loc_nc), ref_loc_nc, rtol=1e-4, atol=1e-4)
    assert np.allclose(np.asarray(z_logsig_nc), ref_logsig_nc, rtol=1e-4, atol=1e-4)

    print("KERNEL_OK")
</pallas_src>

<mosaic_0001>
module attributes {stable_mosaic.version = 11 : i64} {
  func.func @_encoder_kernel(%arg0: i32, %arg1: memref<8x128xf32, #tpu.memory_space<vmem>>, %arg2: memref<128x32xf32, #tpu.memory_space<vmem>>, %arg3: memref<1x32xf32, #tpu.memory_space<vmem>>, %arg4: memref<32x32xf32, #tpu.memory_space<vmem>>, %arg5: memref<1x32xf32, #tpu.memory_space<vmem>>, %arg6: memref<32x16xf32, #tpu.memory_space<vmem>>, %arg7: memref<1x16xf32, #tpu.memory_space<vmem>>, %arg8: memref<8x16xf32, #tpu.memory_space<vmem>>) attributes {dimension_semantics = [#tpu.dimension_semantics<parallel>], iteration_bounds = array<i64: 1>, scalar_prefetch = 0 : i64, scratch_operands = 0 : i64, tpu.core_type = #tpu.core_type<tc>, window_params = [{transform_indices = @transform_0, window_bounds = array<i64: 8, 128>}, {pipeline_mode = #tpu.pipeline_mode<synchronous>, transform_indices = @transform_1, window_bounds = array<i64: 128, 32>}, {pipeline_mode = #tpu.pipeline_mode<synchronous>, transform_indices = @transform_2, window_bounds = array<i64: 1, 32>}, {pipeline_mode = #tpu.pipeline_mode<synchronous>, transform_indices = @transform_3, window_bounds = array<i64: 32, 32>}, {pipeline_mode = #tpu.pipeline_mode<synchronous>, transform_indices = @transform_4, window_bounds = array<i64: 1, 32>}, {pipeline_mode = #tpu.pipeline_mode<synchronous>, transform_indices = @transform_5, window_bounds = array<i64: 32, 16>}, {pipeline_mode = #tpu.pipeline_mode<synchronous>, transform_indices = @transform_6, window_bounds = array<i64: 1, 16>}, {transform_indices = @transform_7, window_bounds = array<i64: 8, 16>}]} {
    %c0 = arith.constant 0 : index
    %c0_0 = arith.constant 0 : index
    %0 = vector.load %arg1[%c0, %c0_0] : memref<8x128xf32, #tpu.memory_space<vmem>>, vector<8x128xf32>
    %c0_1 = arith.constant 0 : index
    %c0_2 = arith.constant 0 : index
    %1 = vector.load %arg2[%c0_1, %c0_2] : memref<128x32xf32, #tpu.memory_space<vmem>>, vector<128x32xf32>
    %cst = arith.constant dense<0.000000e+00> : vector<8x32xf32>
    %2 = tpu.matmul %0, %1, %cst {dimension_numbers = #tpu.dot_dimension_numbers<[1], [0], [0], [1], [0, 0, 1, 1], [], []>} : vector<8x128xf32>, vector<128x32xf32>, vector<8x32xf32> -> vector<8x32xf32>
    %c0_3 = arith.constant 0 : index
    %c0_4 = arith.constant 0 : index
    %3 = vector.load %arg3[%c0_3, %c0_4] : memref<1x32xf32, #tpu.memory_space<vmem>>, vector<1x32xf32>
    %4 = vector.broadcast %3 : vector<1x32xf32> to vector<8x32xf32>
    %5 = arith.addf %2, %4 : vector<8x32xf32>
    %cst_5 = arith.constant 0.000000e+00 : f32
    %6 = vector.broadcast %cst_5 : f32 to vector<8x32xf32>
    %7 = arith.maximumf %5, %6 : vector<8x32xf32>
    %c0_6 = arith.constant 0 : index
    %c0_7 = arith.constant 0 : index
    %8 = vector.load %arg4[%c0_6, %c0_7] : memref<32x32xf32, #tpu.memory_space<vmem>>, vector<32x32xf32>
    %cst_8 = arith.constant dense<0.000000e+00> : vector<8x32xf32>
    %9 = tpu.matmul %7, %8, %cst_8 {dimension_numbers = #tpu.dot_dimension_numbers<[1], [0], [0], [1], [0, 0, 1, 1], [], []>} : vector<8x32xf32>, vector<32x32xf32>, vector<8x32xf32> -> vector<8x32xf32>
    %c0_9 = arith.constant 0 : index
    %c0_10 = arith.constant 0 : index
    %10 = vector.load %arg5[%c0_9, %c0_10] : memref<1x32xf32, #tpu.memory_space<vmem>>, vector<1x32xf32>
    %11 = vector.broadcast %10 : vector<1x32xf32> to vector<8x32xf32>
    %12 = arith.addf %9, %11 : vector<8x32xf32>
    %cst_11 = arith.constant 0.000000e+00 : f32
    %13 = vector.broadcast %cst_11 : f32 to vector<8x32xf32>
    %14 = arith.maximumf %12, %13 : vector<8x32xf32>
    %c0_12 = arith.constant 0 : index
    %c0_13 = arith.constant 0 : index
    %15 = vector.load %arg6[%c0_12, %c0_13] : memref<32x16xf32, #tpu.memory_space<vmem>>, vector<32x16xf32>
    %cst_14 = arith.constant dense<0.000000e+00> : vector<8x16xf32>
    %16 = tpu.matmul %14, %15, %cst_14 {dimension_numbers = #tpu.dot_dimension_numbers<[1], [0], [0], [1], [0, 0, 1, 1], [], []>} : vector<8x32xf32>, vector<32x16xf32>, vector<8x16xf32> -> vector<8x16xf32>
    %c0_15 = arith.constant 0 : index
    %c0_16 = arith.constant 0 : index
    %17 = vector.load %arg7[%c0_15, %c0_16] : memref<1x16xf32, #tpu.memory_space<vmem>>, vector<1x16xf32>
    %18 = vector.broadcast %17 : vector<1x16xf32> to vector<8x16xf32>
    %19 = arith.addf %16, %18 : vector<8x16xf32>
    %c0_17 = arith.constant 0 : index
    %c0_18 = arith.constant 0 : index
    %20 = vector.load %arg8[%c0_17, %c0_18] : memref<8x16xf32, #tpu.memory_space<vmem>>, vector<8x16xf32>
    tpu.vector_store %arg8[%c0_17, %c0_18], %19 {strides = array<i32>} : memref<8x16xf32, #tpu.memory_space<vmem>>, vector<8x16xf32>,
    return
  }
  func.func @transform_0(%arg0: i32) -> (i32, i32) {
    %c0_i32 = arith.constant 0 : i32
    %c0_i32_0 = arith.constant 0 : i32
    return %arg0, %c0_i32 : i32, i32
  }
  func.func @transform_1(%arg0: i32) -> (i32, i32) {
    %c0_i32 = arith.constant 0 : i32
    %c0_i32_0 = arith.constant 0 : i32
    %c0_i32_1 = arith.constant 0 : i32
    return %c0_i32, %c0_i32_0 : i32, i32
  }
  func.func @transform_2(%arg0: i32) -> (i32, i32) {
    %c0_i32 = arith.constant 0 : i32
    %c0_i32_0 = arith.constant 0 : i32
    %c0_i32_1 = arith.constant 0 : i32
    return %c0_i32, %c0_i32_0 : i32, i32
  }
  func.func @transform_3(%arg0: i32) -> (i32, i32) {
    %c0_i32 = arith.constant 0 : i32
    %c0_i32_0 = arith.constant 0 : i32
    %c0_i32_1 = arith.constant 0 : i32
    return %c0_i32, %c0_i32_0 : i32, i32
  }
  func.func @transform_4(%arg0: i32) -> (i32, i32) {
    %c0_i32 = arith.constant 0 : i32
    %c0_i32_0 = arith.constant 0 : i32
    %c0_i32_1 = arith.constant 0 : i32
    return %c0_i32, %c0_i32_0 : i32, i32
  }
  func.func @transform_5(%arg0: i32) -> (i32, i32) {
    %c0_i32 = arith.constant 0 : i32
    %c0_i32_0 = arith.constant 0 : i32
    %c0_i32_1 = arith.constant 0 : i32
    return %c0_i32, %c0_i32_0 : i32, i32
  }
  func.func @transform_6(%arg0: i32) -> (i32, i32) {
    %c0_i32 = arith.constant 0 : i32
    %c0_i32_0 = arith.constant 0 : i32
    %c0_i32_1 = arith.constant 0 : i32
    return %c0_i32, %c0_i32_0 : i32, i32
  }
  func.func @transform_7(%arg0: i32) -> (i32, i32) {
    %c0_i32 = arith.constant 0 : i32
    %c0_i32_0 = arith.constant 0 : i32
    return %arg0, %c0_i32 : i32, i32
  }
}

</mosaic_0001>

<bundles_post_ra>
// kernel: tpu_custom_call.1
= control target key start
LH: loop header
LB: loop body
LE: loop exit
PB: predicated region body
PF: predicated region fallthrough
CT: control target
= control target key end

     0   :  { %12 = vsyncpa [#allocation3], 0  ;;  %v465_v2 = vmov 0.0|0.0   ;;  %vm466_vm0 = vmmov 0   ;;  %v467_v6 = vmov 0.0   ;;  %vm133_vm1 = vcmask 261120   ;;  %s624_s0 = inlined_call_operand.vmem [shape: f32[4,128], index: 0, kind: input, shape index: {}]   ;;  %s625_s1 = inlined_call_operand.vmem [shape: f32[128,32], index: 1, kind: input, shape index: {}]   ;;  %s626_s2 = inlined_call_operand.vmem [shape: f32[1,32], index: 2, kind: input, shape index: {}]   ;;  %s627_s3 = inlined_call_operand.vmem [shape: f32[32,32], index: 3, kind: input, shape index: {}]   ;;  %s628_s4 = inlined_call_operand.vmem [shape: f32[1,32], index: 4, kind: input, shape index: {}]   ;;  %s629_s5 = inlined_call_operand.vmem [shape: f32[32,16], index: 5, kind: input, shape index: {}]   ;;  %s630_s6 = inlined_call_operand.vmem [shape: f32[1,16], index: 6, kind: input, shape index: {}]   ;;  %s631_s7 = inlined_call_operand.hbm [shape: f32[4,16], index: 7, kind: output, shape index: {}]  }
   0x1   :  { %v28_v0 = vld [vmem:[%s625_s1] sm:$0xff]  ;;  %v29_v1 = vld [vmem:[%s625_s1 + $0x8] sm:$0xff]  ;;  %399 = vmatprep.subr.bf16.mxu0 %v465_v2  ;;  %v30_v4 = vld [vmem:[%s625_s1 + $0x10] sm:$0xff]  ;;  %423 = vmatprep.subr.bf16.mxu1 %v465_v2  ;;  %vm292_vm2 = vcmask 130048  }
   0x2   :  { %v400_v3 = vpack.c.bf16 %v29_v1, %v28_v0  ;;  %v31_v5 = vld [vmem:[%s625_s1 + $0x18] sm:$0xff]  ;;  %374 = vmatprep.mubr.msk.f32.mxu0 %vm466_vm0, %v467_v6  ;;  %385 = vmatprep.mubr.msk.f32.mxu1 %vm466_vm0, %v467_v6  ;;  %v32_v8 = vld [vmem:[%s625_s1 + $0x20] sm:$0xff]  ;;  %v33_v9 = vld [vmem:[%s625_s1 + $0x28] sm:$0xff] }
   0x3   :  { %v403_v7 = vpack.c.bf16 %v31_v5, %v30_v4  ;;  %v122_v10 = vld [vmem:[%s627_s3] sm:$0xff]  ;;  %v123_v11 = vld [vmem:[%s627_s3 + $0x8] sm:$0xff]  ;;  %v406_v12 = vpack.c.bf16 %v33_v9, %v32_v8  ;;  %v34_v14 = vld [vmem:[%s625_s1 + $0x30] sm:$0xff] }
   0x4   :  { %401 = vmatpush3.bf16.msra.mxu0 %v400_v3  ;;  %v424_v13 = vpack.c.bf16 %v123_v11, %v122_v10  ;;  %v35_v15 = vld [vmem:[%s625_s1 + $0x38] sm:$0xff]  ;;  %v36_v17 = vld [vmem:[%s625_s1 + $0x40] sm:$0xff]  ;;  %v37_v18 = vld [vmem:[%s625_s1 + $0x48] sm:$0xff] }
   0x5   :  { %402 = vmatprep.subr.bf16.mxu0 %v465_v2  ;;  %v409_v16 = vpack.c.bf16 %v35_v15, %v34_v14  ;;  %v412_v19 = vpack.c.bf16 %v37_v18, %v36_v17  ;;  %v38_v20 = vld [vmem:[%s625_s1 + $0x50] sm:$0xff]  ;;  %v39_v21 = vld [vmem:[%s625_s1 + $0x58] sm:$0xff]  ;;  %v40_v23 = vld [vmem:[%s625_s1 + $0x60] sm:$0xff] }
   0x6   :  { %425 = vmatpush3.bf16.msra.mxu1 %v424_v13  ;;  %v415_v22 = vpack.c.bf16 %v39_v21, %v38_v20  ;;  %v41_v24 = vld [vmem:[%s625_s1 + $0x68] sm:$0xff]  ;;  %v42_v26 = vld [vmem:[%s625_s1 + $0x70] sm:$0xff]  ;;  %v43_v27 = vld [vmem:[%s625_s1 + $0x78] sm:$0xff] }
   0x7   :  { %426 = vmatprep.subr.bf16.mxu1 %v465_v2  ;;  %v418_v25 = vpack.c.bf16 %v41_v24, %v40_v23  ;;  %v421_v28 = vpack.c.bf16 %v43_v27, %v42_v26  ;;  %v27_v29 = vld [vmem:[%s624_s0] sm:$0xff]  ;;  %v124_v30 = vld [vmem:[%s627_s3 + $0x10] sm:$0xff]  ;;  %v125_v31 = vld [vmem:[%s627_s3 + $0x18] sm:$0xff] }
   0x8   :  { %404 = vmatpush3.bf16.msra.mxu0 %v403_v7  ;;  %v427_v32 = vpack.c.bf16 %v125_v31, %v124_v30  ;;  %v310_v33 = vld [vmem:[%s626_s2] ss:$0 sm:$0xff]  ;;  %v209_v35 = vld [vmem:[%s629_s5 + $0x8] sm:$0xff]  ;;  %v210_v41 = vld [vmem:[%s629_s5 + $0x10] sm:$0xff] }
   0x9   :  { %405 = vmatprep.subr.bf16.mxu0 %v465_v2  ;;  %v208_v34 = vld [vmem:[%s629_s5] sm:$0xff]  ;;  %v211_v42 = vld [vmem:[%s629_s5 + $0x18] sm:$0xff] }
   0xa   :  { %428 = vmatpush3.bf16.msra.mxu1 %v427_v32  ;;  %v430_v39 = vpack.c.bf16 %v209_v35, %v208_v34  ;;  %v433_v43 = vpack.c.bf16 %v211_v42, %v210_v41  ;;  %v311_v44 = vld [vmem:[%s628_s4] ss:$0 sm:$0xff] }
   0xb   :  { %429 = vmatprep.subr.bf16.mxu1 %v465_v2  ;;  %v313_v49 = vld [vmem:[%s630_s6] ss:$0 sm:$0xff] }
   0xc   :  { %407 = vmatpush3.bf16.msra.mxu0 %v406_v12 }
   0xd   :  { %408 = vmatprep.subr.bf16.mxu0 %v465_v2 }
  0x10   :  { %410 = vmatpush3.bf16.msra.mxu0 %v409_v16 }
  0x11   :  { %411 = vmatprep.subr.bf16.mxu0 %v465_v2 }
  0x14   :  { %413 = vmatpush3.bf16.msra.mxu0 %v412_v19 }
  0x15   :  { %414 = vmatprep.subr.bf16.mxu0 %v465_v2 }
  0x18   :  { %416 = vmatpush3.bf16.msra.mxu0 %v415_v22 }
  0x19   :  { %417 = vmatprep.subr.bf16.mxu0 %v465_v2 }
  0x1c   :  { %419 = vmatpush3.bf16.msra.mxu0 %v418_v25 }
  0x1d   :  { %420 = vmatprep.subr.bf16.mxu0 %v465_v2 }
  0x20   :  { %422 = vmatpush3.bf16.msra.mxu0 %v421_v28 }
  0x23   :  { %375 = vmatmul.mubr.f32.vlgmr.msra.gmra.mrb[0].mxu0 %v27_v29 }
  0xf6   :  { %v117_v36 = vpop.f32.mrb[0].mxu0 }
  0xf7   :  { %v118_v37 = vadd.f32 %v310_v33, %v117_v36  ;;  %v376_v38 = vpop.f32.mrb[1].mxu0 }
  0xf9   :  { %v121_v40 = vmax.f32 %v118_v37, 0.0 }
  0xfb   :  { %386 = vmatmul.mubr.msk.f32.vlgmr.msra.gmra.mrb[0].mxu1 %vm133_vm1, %v121_v40 }
  0xfc   :  { %431 = vmatpush3.bf16.msra.mxu1 %v430_v39  ;;  %396 = vmatprep.mubr.msk.f32.mxu1 %vm466_vm0, %v467_v6 }
  0xfd   :  { %432 = vmatprep.subr.bf16.mxu1 %v465_v2 }
 0x100   :  { %434 = vmatpush3.bf16.msra.mxu1 %v433_v43 }
 0x1ce   :  { %v203_v45 = vpop.f32.mrb[0].mxu1 }
 0x1cf   :  { %v204_v46 = vadd.f32 %v311_v44, %v203_v45  ;;  %v387_v47 = vpop.f32.mrb[1].mxu1 }
 0x1d1   :  { %v207_v48 = vmax.f32 %v204_v46, 0.0 }
 0x1d3   :  { %397 = vmatmul.mubr.msk.f32.vlgmr.msra.gmra.mrb[2].mxu1 %vm133_vm1, %v207_v48 }
 0x2a6   :  { %v288_v50 = vpop.f32.mrb[2].mxu1 }
 0x2a7   :  { %v289_v51 = vadd.f32 %v313_v49, %v288_v50  ;;  %v398_v52 = vpop.f32.mrb[3].mxu1 }
 0x2a9   :  { %293 = vst.msk [vmem:[#allocation2] sm:$0xff] %vm292_vm2, %v289_v51 }
 0x2aa   :  { %298 = vsyncadd [#allocation3], 64  ;;  %s468_s5 = smov [#allocation2]  }
 0x2ab   :  { %s299_s30 = sshll.u32 %s468_s5, 4  ;;  %s300_s30 = int_to_ptr.vmem [resolvable:$true] %s299_s30 }
 0x2ac   :  { %s441_s4 = scalar_lea.vmem %s300_s30, 64  ;;  %s445_s8 = scalar_lea.vmem %s300_s30, 128 }
 0x2ad   :  { %p442_p0 = scmp.ne.s32.totalorder %s300_s30, %s441_s4  ;;  %p446_p1 = scmp.lt.s32.totalorder %s300_s30, %s300_s30 }
 0x2ae   :  { %p447_p2 = scmp.lt.s32.totalorder %s445_s8, %s441_s4 }
 0x2b0   :  { %p448_p3 = por %p447_p2, %p446_p1 }
 0x2b2   :  { %p449_p4 = pnand %p448_p3, %p442_p0 }
 0x2b4   :  { %452 = shalt.err (!%p449_p4)
}
 0x2b5   :  { %s453_s6 = scalar_lea.hbm %s631_s7, 64 }
 0x2b6   :  { %p454_p5 = scmp.ne.s32.totalorder %s631_s7, %s453_s6  ;;  %p457_p6 = scmp.lt.u32.totalorder %s453_s6, %s631_s7 }
 0x2b8   :  { %p459_p7 = pnand %p457_p6, %p454_p5 }
 0x2ba   :  { %462 = shalt.err (!%p459_p7)
}
 0x2bb   :  { %s469_s15 = smov 64   ;;  %s470_s16 = smov 4  }
 0x2bc   :  { %305 = dma.vmem_to_hbm [thread:$0]  %s300_s30, 64, %s631_s7, [#allocation3], %s469_s15, %s469_s15, %s470_s16  }
 0x2bd   :  { %463 = dma.done.wait [#allocation3], 128  }
 0x2be   :  { %464 = vsyncadd [#allocation3], 4294967168 }
 0x2bf   :  { %309 = vsyncpa [#allocation3], 1 }

</bundles_post_ra>
